<compile_context>
chip_gen: v7x
topology: tpu7x:2x2x1
jax: 0.10.0
libtpu: 0.0.40
codegen_flags: <defaults>
</compile_context>

<pallas_src>
import functools
import math

import jax
import jax.numpy as jnp
from jax import lax
from jax.experimental import pallas as pl
from jax.experimental.pallas import tpu as pltpu

LANES = 128
_STATIC_FOLD_LIMIT = 8    # <= this many 128-lane folds per block: full static unroll
_MIN_BUFFERED_STEPS = 4   # use 3-deep input buffering only when the HW stream is long
_MAX_ACC = 4              # independent f32 accumulators in the fold loop


def _vmem_capacity_bytes(default=64 * 1024 * 1024):
    """Best-effort physical VMEM query; conservative (v7x) fallback."""
    try:
        info = pltpu.get_tpu_info()
    except Exception:
        return default
    for name in ("vmem_capacity_bytes", "vmem_bytes", "vmem_size_bytes"):
        v = getattr(info, name, None)
        if v:
            try:
                v = int(v)
            except (TypeError, ValueError):
                continue
            if v > 0:
                return v
    return default


def _nbytes(a):
    return a.size * jnp.dtype(a.dtype).itemsize


def _partial_sums(x_ref, *, num_folds, nacc, unroll, use_fori, valid):
    """Lane-parallel (C, 128) f32 partial sums of the current (C, tile) block.

    `valid`: number of in-bounds lanes in this block (traced scalar) or None when
    the whole block is valid.  Masking only runs on the ragged last HW step.
    """
    C = x_ref.shape[0]
    lane_iota = None
    if valid is not None:
        # Hoisted out of the loop (JAX does not CSE broadcast_in_dim).
        lane_iota = lax.broadcasted_iota(jnp.int32, (C, LANES), 1)

    def chunk(start):
        if isinstance(start, int):
            v = x_ref[:, start:start + LANES]
        else:
            start = pl.multiple_of(start, LANES)
            v = x_ref[:, pl.ds(start, LANES)]
        v = v.astype(jnp.float32)
        if lane_iota is not None:
            v = jnp.where(lane_iota + start < valid, v, 0.0)
        return v

    if not use_fori:
        # Small fold counts: full static unroll, still with split accumulator chains.
        accs = [jnp.zeros((C, LANES), jnp.float32) for _ in range(nacc)]
        for g in range(num_folds):
            accs[g % nacc] = accs[g % nacc] + chunk(g * LANES)
    else:
        # Large fold counts: rolled loop with modest unroll + nacc independent
        # accumulators -> bounded bundle size and register pressure.
        num_outer = num_folds // nacc   # nacc divides num_folds by construction

        def body(i, accs):
            base = i * (nacc * LANES)
            return tuple(accs[j] + chunk(base + j * LANES) for j in range(nacc))

        accs = lax.fori_loop(
            0, num_outer, body,
            tuple(jnp.zeros((C, LANES), jnp.float32) for _ in range(nacc)),
            unroll=unroll)
        accs = list(accs)

    total = accs[0]
    for a in accs[1:]:
        total = total + a
    return total


def _channel_attention_kernel(x_ref, w1_ref, b1_ref, w2t_ref, b2_ref, o_ref,
                              acc_ref, *, hw, tile, num_folds, nacc, unroll,
                              use_fori, inv_hw, ragged):
    # x_ref: (C, tile) (batch dim squeezed); acc_ref: (C, 128) f32 scratch.
    k = pl.program_id(1)
    last = pl.num_programs(1) - 1

    @pl.when(k == 0)
    def _init():
        acc_ref[...] = jnp.zeros_like(acc_ref)

    if ragged:
        # Only the last HW step pays the masking cost; earlier steps are unmasked.
        @pl.when(k < last)
        def _full_blocks():
            acc_ref[...] += _partial_sums(
                x_ref, num_folds=num_folds, nacc=nacc, unroll=unroll,
                use_fori=use_fori, valid=None)

        @pl.when(k == last)
        def _tail_block():
            acc_ref[...] += _partial_sums(
                x_ref, num_folds=num_folds, nacc=nacc, unroll=unroll,
                use_fori=use_fori, valid=hw - k * tile)
    else:
        acc_ref[...] += _partial_sums(
            x_ref, num_folds=num_folds, nacc=nacc, unroll=unroll,
            use_fori=use_fori, valid=None)

    @pl.when(k == last)
    def _finalize():
        # Single cross-lane reduce + mean: AdaptiveAvgPool2d((1,1)) == mean over HW.
        pooled = jnp.sum(acc_ref[...], axis=-1, keepdims=True) * inv_hw       # (C, 1)

        # fc1 + ReLU: broadcast-mul + sublane reduce (VPU/XLU), no transpose.
        h = jnp.sum(pooled * w1_ref[...], axis=0, keepdims=True) + b1_ref[...]  # (1, hidden)
        h = jnp.maximum(h, 0.0)

        # fc2 + sigmoid: w2 is passed transposed as (low, hidden) so this is also
        # a broadcast-mul + lane reduce instead of a padded MXU matmul.
        y = jnp.sum(h * w2t_ref[...], axis=-1, keepdims=True) + b2_ref[...]     # (low, 1)
        o_ref[0] = jax.nn.sigmoid(y).astype(o_ref.dtype)


def channel_attention(x, w1, b1, w2, b2, *, target_block_bytes=None):
    """Fused ChannelAttention forward.

    x:  (B, C, H, W)  NCHW activations (f32 or bf16)
    w1: (C, hidden)   fc1 weight, (in, out) layout (transposed vs PyTorch)
    b1: (hidden,)
    w2: (hidden, low) fc2 weight, (in, out) layout (transposed vs PyTorch)
    b2: (low,)
    Returns (B, low, 1, 1).
    """
    B, C, H, W = x.shape
    HW = H * W
    hidden = w1.shape[1]
    low = w2.shape[1]
    itemsize = jnp.dtype(x.dtype).itemsize

    # ---- Generation-aware HW tile: big blocks amortize the ~0.35 us per-grid-step
    # overhead while staying inside every generation's VMEM (v7x: 64 MiB/core).
    vmem_cap = _vmem_capacity_bytes()
    if target_block_bytes is None:
        target_block_bytes = (vmem_cap * 6 // 10) // 3        # ~12.8 MiB v7x, 16 MiB v5e/v6e
        target_block_bytes = max(1 << 20, min(16 << 20, target_block_bytes))

    hw_lanes = pl.cdiv(HW, LANES) * LANES
    max_tile = max(LANES, (target_block_bytes // (C * itemsize)) // LANES * LANES)
    if max_tile >= _MAX_ACC * LANES:
        max_tile = (max_tile // (_MAX_ACC * LANES)) * (_MAX_ACC * LANES)
    tile = min(max_tile, hw_lanes)
    num_blocks = pl.cdiv(HW, tile)
    ragged = (HW % tile) != 0        # handled with in-kernel masking: NO jnp.pad copy

    num_folds = tile // LANES
    if num_folds % 4 == 0:
        nacc = 4
    elif num_folds % 2 == 0:
        nacc = 2
    else:
        nacc = 1
    use_fori = num_folds > _STATIC_FOLD_LIMIT
    unroll = max(1, min(8, num_folds // nacc))

    x_flat = x.reshape(B, C, HW)     # free view: NCHW -> (B, C, HW)

    # ---- Streamed x: 3-deep buffering when there is enough HW streaming to hide
    # DMA-issue latency at step boundaries; otherwise default double buffering.
    x_block = (pl.Squeezed(), C, tile)
    x_index_map = lambda b, k: (b, 0, k)
    x_buffers = 3 if num_blocks >= _MIN_BUFFERED_STEPS else 2
    if x_buffers != 2:
        try:
            x_spec = pl.BlockSpec(x_block, x_index_map,
                                  pipeline_mode=pl.Buffered(x_buffers))
        except (TypeError, AttributeError):
            x_buffers = 2
            x_spec = pl.BlockSpec(x_block, x_index_map)
    else:
        x_spec = pl.BlockSpec(x_block, x_index_map)

    # fc2 weight transposed once (tiny, one-time, outside the hot path).
    w2t = w2.T
    b1v = b1.reshape(1, hidden)
    b2v = b2.reshape(low, 1)

    # ---- VMEM budget from the actual buffer math (+ slack).
    vmem_limit = (x_buffers * C * tile * itemsize
                  + 2 * (_nbytes(w1) + _nbytes(b1v) + _nbytes(w2t) + _nbytes(b2v))
                  + C * LANES * 4            # f32 accumulator scratch
                  + 2 * low * itemsize       # output block buffers
                  + (4 << 20))               # headroom for compiler internals
    vmem_limit = int(min(max(32 << 20, vmem_limit), vmem_cap))

    kernel = functools.partial(
        _channel_attention_kernel,
        hw=HW, tile=tile, num_folds=num_folds, nacc=nacc, unroll=unroll,
        use_fori=use_fori, inv_hw=1.0 / float(HW), ragged=ragged)

    out = pl.pallas_call(
        kernel,
        out_shape=jax.ShapeDtypeStruct((B, low, 1), x.dtype),
        grid_spec=pltpu.PrefetchScalarGridSpec(
            num_scalar_prefetch=0,
            grid=(B, num_blocks),
            in_specs=[
                x_spec,
                # Weights / biases: constant block index -> fetched once, stay resident.
                pl.BlockSpec((C, hidden), lambda b, k: (0, 0)),
                pl.BlockSpec((1, hidden), lambda b, k: (0, 0)),
                pl.BlockSpec((low, hidden), lambda b, k: (0, 0)),
                pl.BlockSpec((low, 1), lambda b, k: (0, 0)),
            ],
            out_specs=pl.BlockSpec((1, low, 1), lambda b, k: (b, 0, 0)),
            scratch_shapes=[pltpu.VMEM((C, LANES), jnp.float32)],
        ),
        compiler_params=pltpu.CompilerParams(
            # Batch axis sharded across TensorCores; HW is the trailing reduction axis.
            # TODO(synk): for B == 1 on v7x, split the HW reduction across both
            # TensorCores (per-core partial sums + tiny epilogue) so both cores'
            # DMA engines contribute to HBM bandwidth.
            dimension_semantics=("parallel", "arbitrary"),
            vmem_limit_bytes=vmem_limit,
        ),
    )(x_flat, w1, b1v, w2t, b2v)

    return out.reshape(B, low, 1, 1)


def init_params(key, low_level_input_channels, pyramid_input_channels,
                dtype=jnp.float32):
    """Deterministic synthetic init mirroring nn.Linear shapes.

    PyTorch stores Linear weight as (out, in); we keep the (in, out) orientation
    for both layers (the wrapper transposes fc2 for the kernel internally).
    """
    in_channels = low_level_input_channels + pyramid_input_channels
    hidden = in_channels // 16
    k1, k2, k3, k4 = jax.random.split(key, 4)

    bound1 = 1.0 / math.sqrt(in_channels)
    bound2 = 1.0 / math.sqrt(hidden)
    w1 = jax.random.uniform(k1, (in_channels, hidden), dtype, -bound1, bound1)
    b1 = jax.random.uniform(k2, (hidden,), dtype, -bound1, bound1)
    w2 = jax.random.uniform(k3, (hidden, low_level_input_channels), dtype,
                            -bound2, bound2)
    b2 = jax.random.uniform(k4, (low_level_input_channels,), dtype,
                            -bound2, bound2)
    return w1, b1, w2, b2


if __name__ == "__main__":
    # Small shapes consistent with the module (in_channels // 16 must be >= 1).
    low_level_channels = 32
    pyramid_channels = 32
    C = low_level_channels + pyramid_channels

    key = jax.random.PRNGKey(0)
    kp, kx = jax.random.split(key)
    w1, b1, w2, b2 = init_params(kp, low_level_channels, pyramid_channels)

    def reference(x):
        B = x.shape[0]
        pooled = jnp.mean(x.reshape(B, C, -1), axis=-1)
        y = jax.nn.sigmoid(jnp.maximum(pooled @ w1 + b1, 0.0) @ w2 + b2)
        return y.reshape(B, low_level_channels, 1, 1)

    tests = [
        # (shape, wrapper kwargs)
        ((2, C, 16, 16), {}),                                   # lane-aligned HW
        ((2, C, 15, 15), {}),                                   # ragged HW (masked tail)
        ((2, C, 20, 28), {"target_block_bytes": 64 * 1024}),    # multi-block + ragged tail
    ]
    for i, (shape, kwargs) in enumerate(tests):
        x = jax.random.normal(jax.random.fold_in(kx, i), shape, jnp.float32)
        out = jax.block_until_ready(channel_attention(x, w1, b1, w2, b2, **kwargs))
        ref = reference(x)
        assert out.shape == ref.shape, f"shape mismatch for {shape}"
        assert jnp.allclose(out, ref, atol=1e-5), f"mismatch vs reference for {shape}"

    print("KERNEL_OK")
</pallas_src>

<mosaic_0001>
module attributes {stable_mosaic.version = 11 : i64} {
  func.func @_channel_attention_kernel(%arg0: i32, %arg1: i32, %arg2: memref<1x64x256xf32, #tpu.memory_space<vmem>>, %arg3: memref<64x4xf32, #tpu.memory_space<vmem>>, %arg4: memref<1x4xf32, #tpu.memory_space<vmem>>, %arg5: memref<32x4xf32, #tpu.memory_space<vmem>>, %arg6: memref<32x1xf32, #tpu.memory_space<vmem>>, %arg7: memref<1x32x1xf32, #tpu.memory_space<vmem>>, %arg8: memref<64x128xf32, #tpu.memory_space<vmem>>) attributes {dimension_semantics = [#tpu.dimension_semantics<parallel>, #tpu.dimension_semantics<arbitrary>], iteration_bounds = array<i64: 2, 1>, scalar_prefetch = 0 : i64, scratch_operands = 1 : i64, tpu.core_type = #tpu.core_type<tc>, window_params = [{transform_indices = @transform_0, window_bounds = array<i64: 1, 64, 256>}, {pipeline_mode = #tpu.pipeline_mode<synchronous>, transform_indices = @transform_1, window_bounds = array<i64: 64, 4>}, {pipeline_mode = #tpu.pipeline_mode<synchronous>, transform_indices = @transform_2, window_bounds = array<i64: 1, 4>}, {pipeline_mode = #tpu.pipeline_mode<synchronous>, transform_indices = @transform_3, window_bounds = array<i64: 32, 4>}, {pipeline_mode = #tpu.pipeline_mode<synchronous>, transform_indices = @transform_4, window_bounds = array<i64: 32, 1>}, {transform_indices = @transform_5, window_bounds = array<i64: 1, 32, 1>}]} {
    %c0_i32 = arith.constant 0 : i32
    %0 = arith.cmpi eq, %arg1, %c0_i32 : i32
    %1 = arith.extui %0 : i1 to i32
    %c0_i32_0 = arith.constant 0 : i32
    %2 = arith.cmpi ne, %1, %c0_i32_0 : i32
    scf.if %2 {
      %cst_12 = arith.constant 0.000000e+00 : f32
      %18 = vector.broadcast %cst_12 : f32 to vector<64x128xf32>
      %c0_13 = arith.constant 0 : index
      %c0_14 = arith.constant 0 : index
      %19 = vector.load %arg8[%c0_13, %c0_14] : memref<64x128xf32, #tpu.memory_space<vmem>>, vector<64x128xf32>
      tpu.vector_store %arg8[%c0_13, %c0_14], %18 {strides = array<i32>} : memref<64x128xf32, #tpu.memory_space<vmem>>, vector<64x128xf32>,
    } else {
    }
    %c0 = arith.constant 0 : index
    %c0_1 = arith.constant 0 : index
    %3 = vector.load %arg8[%c0, %c0_1] : memref<64x128xf32, #tpu.memory_space<vmem>>, vector<64x128xf32>
    %cst = arith.constant 0.000000e+00 : f32
    %4 = vector.broadcast %cst : f32 to vector<64x128xf32>
    %cst_2 = arith.constant 0.000000e+00 : f32
    %5 = vector.broadcast %cst_2 : f32 to vector<64x128xf32>
    %c0_3 = arith.constant 0 : index
    %c0_4 = arith.constant 0 : index
    %c0_5 = arith.constant 0 : index
    %6 = vector.load %arg2[%c0_3, %c0_4, %c0_5] : memref<1x64x256xf32, #tpu.memory_space<vmem>>, vector<1x64x128xf32>
    %7 = vector.shape_cast %6 : vector<1x64x128xf32> to vector<64x128xf32>
    %8 = arith.addf %4, %7 : vector<64x128xf32>
    %c0_6 = arith.constant 0 : index
    %c0_7 = arith.constant 0 : index
    %c128 = arith.constant 128 : index
    %9 = vector.load %arg2[%c0_6, %c0_7, %c128] : memref<1x64x256xf32, #tpu.memory_space<vmem>>, vector<1x64x128xf32>
    %10 = vector.shape_cast %9 : vector<1x64x128xf32> to vector<64x128xf32>
    %11 = arith.addf %5, %10 : vector<64x128xf32>
    %12 = arith.addf %8, %11 : vector<64x128xf32>
    %13 = arith.addf %3, %12 : vector<64x128xf32>
    %c0_8 = arith.constant 0 : index
    %c0_9 = arith.constant 0 : index
    %14 = vector.load %arg8[%c0_8, %c0_9] : memref<64x128xf32, #tpu.memory_space<vmem>>, vector<64x128xf32>
    tpu.vector_store %arg8[%c0_8, %c0_9], %13 {strides = array<i32>} : memref<64x128xf32, #tpu.memory_space<vmem>>, vector<64x128xf32>,
    %c0_i32_10 = arith.constant 0 : i32
    %15 = arith.cmpi eq, %arg1, %c0_i32_10 : i32
    %16 = arith.extui %15 : i1 to i32
    %c0_i32_11 = arith.constant 0 : i32
    %17 = arith.cmpi ne, %16, %c0_i32_11 : i32
    scf.if %17 {
      %c0_12 = arith.constant 0 : index
      %c0_13 = arith.constant 0 : index
      %18 = vector.load %arg8[%c0_12, %c0_13] : memref<64x128xf32, #tpu.memory_space<vmem>>, vector<64x128xf32>
      %cst_14 = arith.constant dense<0.000000e+00> : vector<64xf32>
      %19 = vector.multi_reduction <add>, %18, %cst_14 [1] : vector<64x128xf32> to vector<64xf32>
      %20 = vector.shape_cast %19 : vector<64xf32> to vector<64x1xf32>
      %cst_15 = arith.constant 3.906250e-03 : f32
      %21 = vector.broadcast %cst_15 : f32 to vector<64x1xf32>
      %22 = arith.mulf %20, %21 : vector<64x1xf32>
      %c0_16 = arith.constant 0 : index
      %c0_17 = arith.constant 0 : index
      %23 = vector.load %arg3[%c0_16, %c0_17] : memref<64x4xf32, #tpu.memory_space<vmem>>, vector<64x4xf32>
      %24 = vector.broadcast %22 : vector<64x1xf32> to vector<64x4xf32>
      %25 = arith.mulf %24, %23 : vector<64x4xf32>
      %cst_18 = arith.constant dense<0.000000e+00> : vector<4xf32>
      %26 = vector.multi_reduction <add>, %25, %cst_18 [0] : vector<64x4xf32> to vector<4xf32>
      %27 = vector.shape_cast %26 : vector<4xf32> to vector<1x4xf32>
      %c0_19 = arith.constant 0 : index
      %c0_20 = arith.constant 0 : index
      %28 = vector.load %arg4[%c0_19, %c0_20] : memref<1x4xf32, #tpu.memory_space<vmem>>, vector<1x4xf32>
      %29 = arith.addf %27, %28 : vector<1x4xf32>
      %cst_21 = arith.constant 0.000000e+00 : f32
      %30 = vector.broadcast %cst_21 : f32 to vector<1x4xf32>
      %31 = arith.maximumf %29, %30 : vector<1x4xf32>
      %c0_22 = arith.constant 0 : index
      %c0_23 = arith.constant 0 : index
      %32 = vector.load %arg5[%c0_22, %c0_23] : memref<32x4xf32, #tpu.memory_space<vmem>>, vector<32x4xf32>
      %33 = vector.broadcast %31 : vector<1x4xf32> to vector<32x4xf32>
      %34 = arith.mulf %33, %32 : vector<32x4xf32>
      %cst_24 = arith.constant dense<0.000000e+00> : vector<32xf32>
      %35 = vector.multi_reduction <add>, %34, %cst_24 [1] : vector<32x4xf32> to vector<32xf32>
      %36 = vector.shape_cast %35 : vector<32xf32> to vector<32x1xf32>
      %c0_25 = arith.constant 0 : index
      %c0_26 = arith.constant 0 : index
      %37 = vector.load %arg6[%c0_25, %c0_26] : memref<32x1xf32, #tpu.memory_space<vmem>>, vector<32x1xf32>
      %38 = arith.addf %36, %37 : vector<32x1xf32>
      %39 = arith.negf %38 : vector<32x1xf32>
      %40 = math.exp %39 : vector<32x1xf32>
      %cst_27 = arith.constant 1.000000e+00 : f32
      %41 = vector.broadcast %cst_27 : f32 to vector<32x1xf32>
      %42 = arith.addf %41, %40 : vector<32x1xf32>
      %43 = arith.divf %41, %42 : vector<32x1xf32>
      %c0_28 = arith.constant 0 : index
      %c0_29 = arith.constant 0 : index
      %c0_30 = arith.constant 0 : index
      %44 = vector.load %arg7[%c0_28, %c0_29, %c0_30] : memref<1x32x1xf32, #tpu.memory_space<vmem>>, vector<1x32x1xf32>
      %45 = vector.shape_cast %44 : vector<1x32x1xf32> to vector<32x1xf32>
      %46 = vector.shape_cast %43 : vector<32x1xf32> to vector<1x32x1xf32>
      tpu.vector_store %arg7[%c0_28, %c0_29, %c0_30], %46 {strides = array<i32>} : memref<1x32x1xf32, #tpu.memory_space<vmem>>, vector<1x32x1xf32>,
    } else {
    }
    return
  }
  func.func @transform_0(%arg0: i32, %arg1: i32) -> (i32, i32, i32) {
    %c0_i32 = arith.constant 0 : i32
    %c0_i32_0 = arith.constant 0 : i32
    return %arg0, %c0_i32, %arg1 : i32, i32, i32
  }
  func.func @transform_1(%arg0: i32, %arg1: i32) -> (i32, i32) {
    %c0_i32 = arith.constant 0 : i32
    %c0_i32_0 = arith.constant 0 : i32
    %c0_i32_1 = arith.constant 0 : i32
    return %c0_i32, %c0_i32_0 : i32, i32
  }
  func.func @transform_2(%arg0: i32, %arg1: i32) -> (i32, i32) {
    %c0_i32 = arith.constant 0 : i32
    %c0_i32_0 = arith.constant 0 : i32
    %c0_i32_1 = arith.constant 0 : i32
    return %c0_i32, %c0_i32_0 : i32, i32
  }
  func.func @transform_3(%arg0: i32, %arg1: i32) -> (i32, i32) {
    %c0_i32 = arith.constant 0 : i32
    %c0_i32_0 = arith.constant 0 : i32
    %c0_i32_1 = arith.constant 0 : i32
    return %c0_i32, %c0_i32_0 : i32, i32
  }
  func.func @transform_4(%arg0: i32, %arg1: i32) -> (i32, i32) {
    %c0_i32 = arith.constant 0 : i32
    %c0_i32_0 = arith.constant 0 : i32
    %c0_i32_1 = arith.constant 0 : i32
    return %c0_i32, %c0_i32_0 : i32, i32
  }
  func.func @transform_5(%arg0: i32, %arg1: i32) -> (i32, i32, i32) {
    %c0_i32 = arith.constant 0 : i32
    %c0_i32_0 = arith.constant 0 : i32
    %c0_i32_1 = arith.constant 0 : i32
    return %arg0, %c0_i32, %c0_i32_0 : i32, i32, i32
  }
}

</mosaic_0001>

<bundles_post_ra>
// kernel: tpu_custom_call.1
= control target key start
LH: loop header
LB: loop body
LE: loop exit
PB: predicated region body
PF: predicated region fallthrough
CT: control target
= control target key end

     0   :  { %10 = vsyncpa [#allocation4], 0  ;;  %s947_s0 = inlined_call_operand.hbm [shape: f32[2,64,256], index: 0, kind: input, shape index: {}]   ;;  %s948_s1 = inlined_call_operand.vmem [shape: f32[64,4], index: 1, kind: input, shape index: {}]   ;;  %s949_s2 = inlined_call_operand.vmem [shape: f32[1,4], index: 2, kind: input, shape index: {}]   ;;  %s950_s3 = inlined_call_operand.vmem [shape: f32[32,4], index: 3, kind: input, shape index: {}]   ;;  %s951_s4 = inlined_call_operand.vmem [shape: f32[32,1], index: 4, kind: input, shape index: {}]   ;;  %s952_s5 = inlined_call_operand.vmem [shape: f32[2,32,1], index: 5, kind: output, shape index: {}]  }
   0x1   :  { %12 = vsyncpa [#allocation4 + $0x1], 0  ;;  %s760_s18 = smov 0   ;;  %s762_s19 = smov 0  }
   0x2   :  { %s764_s20 = smov 0   ;;  %s766_s21 = smov 0  }
   0x3   :  { %s768_s22 = smov 0   ;;  %s770_s23 = smov 0  }
   0x4 LB: > { %s553_s24 = sadd.s32 4294967295, %s725_s23   ;;  %s30_s25 = sadd.s32 1, %s721_s22  ;;  %s725_s23 = sphi %s770_s23, %s18_s23   ;;  %s721_s22 = sphi %s768_s22, %s960_s22   ;;  %s717_s21 = sphi %s766_s21, %s959_s21   ;;  %s713_s20 = sphi %s764_s20, %s958_s20   ;;  %s709_s19 = sphi %s762_s19, %s957_s19   ;;  %s705_s18 = sphi %s760_s18, %s956_s18  }
   0x5   : > { %p32_p0 = scmp.ge.s32.totalorder %s30_s25, 2  ;;  %s39_s26 = sadd.s32 1, %s713_s20 }
   0x6   : > { %p46_p1 = scmp.ne.s32.totalorder %s713_s20, %s709_s19  ;;  %p47_p2 = scmp.eq.s32.totalorder %s725_s23, 0 }
   0x7   : > { %s962_s25 = smov (%p32_p0, %s30_s25), 0  ;;  %p52_p4 = scmp.ne.s32.totalorder %s709_s19, %s705_s18 }
   0x8   : > { %p796_p3 = por %p47_p2, %p46_p1  ;;  %s34_s28 = ssub.s32 %s721_s22, %s962_s25 }
   0x9   : > { %p53_p5 = scmp.eq.s32.totalorder %s553_s24, 0  ;;  %p37_p6 = scmp.eq.s32.totalorder %s34_s28, 0 }
   0xa   : > { %p578_p8 = scmp.lt.s32.totalorder %s725_s23, 2  ;;  %s198_s6 = sand.u32 1, %s713_s20  }
   0xb   : > { %p803_p7 = por %p53_p5, %p52_p4  ;;  %s570_s7 = sshll.u32 %s721_s22, 11 }
   0xc   : > { %s809_s30 = scalar_select %p37_p6, %s713_s20, %s39_s26  }
   0xd   : > { %s557_s8 = sshll.u32 %s198_s6, 7  ;;  %s816_s11 = scalar_lea.hbm %s947_s0, %s570_s7 }
   0xe   : > { %s202_s12 = scalar_lea.vmem [#allocation3], %s557_s8  ;;  %p820_p9 = pnand %p578_p8, %p796_p3 }
   0xf   : > { %s211_s13 = sshll.u32 %s202_s12, 4  ;;  %s826_s15 = scalar_lea.sflag [#allocation4], %s198_s6  ;;  %s824_s13 = int_to_ptr.vmem [resolvable:$true] %s211_s13 }
  0x10   : > { %s645_s16 = scalar_lea.hbm %s816_s11, 2048  ;;  %p647_p11 = pneg %p820_p9 }
  0x11   : > { %p646_p10 = scmp.ne.s32.totalorder %s816_s11, %s645_s16  ;;  %s650_s24 = scalar_lea.hbm %s947_s0, 4096 }
  0x12   : > { %p651_p0 = scmp.lt.u32.totalorder %s816_s11, %s947_s0  ;;  %p652_p1 = scmp.lt.u32.totalorder %s650_s24, %s645_s16 }
  0x13   : > { %p648_p12 = pnand %p647_p11, %p646_p10  ;;  %p654_p3 = scmp.lt.u32.totalorder %s645_s16, %s816_s11 }
  0x14   : > { %p653_p2 = por %p652_p1, %p651_p0 }
  0x15   : > { %p649_p13 = pneg %p648_p12 }
  0x16   : > { %p655_p4 = por %p654_p3, %p653_p2 }
  0x18   : > { %p656_p5 = pnand %p655_p4, %p649_p13 }
  0x1a   : > { %659 = shalt.err (!%p656_p5)
}
  0x1b   : > { %s660_s28 = scalar_lea.vmem %s824_s13, 2048  ;;  %s727_s6 = smov [#allocation3]  }
  0x1c   : > { %p661_p6 = scmp.ne.s32.totalorder %s824_s13, %s660_s28  ;;  %s665_s7 = sshll.u32 %s727_s6, 4  ;;  %s666_s7 = int_to_ptr.vmem [resolvable:$false] %s665_s7 }
  0x1d   : > { %s667_s8 = scalar_lea.vmem %s666_s7, 4096  ;;  %p668_p12 = scmp.lt.s32.totalorder %s824_s13, %s666_s7 }
  0x1e   : > { %p663_p8 = pnand %p661_p6, %p647_p11  ;;  %p669_p0 = scmp.lt.s32.totalorder %s667_s8, %s660_s28 }
  0x20   : > { %p664_p10 = pneg %p663_p8  ;;  %p670_p1 = por %p669_p0, %p668_p12 }
  0x22   : > { %p671_p2 = pnand %p670_p1, %p664_p10 }
  0x24   : > { %674 = shalt.err (!%p671_p2)
}
  0x25   : > { %s728_s9 = smov 256   ;;  %s729_s10 = smov 16  }
  0x26   : > { %577 = dma.hbm_to_vmem [thread:$0]  (!%p820_p9), %s816_s11, 2048, %s824_s13, %s826_s15, %s728_s9, %s728_s9, %s729_s10  }
  0x27   : > { %p560_p11 = scmp.ge.s32.totalorder %s725_s23, 1  ;;  %p219_p13 = scmp.lt.s32.totalorder %s725_s23, 3 }
  0x29   : > { %p220_p3 = pnand %p560_p11, %p219_p13 }
  0x2a   : > { %s225_s12 = sand.u32 (!%p220_p3), 1, %s709_s19  }
  0x2b   : > { %223 = sbr.rel (%p220_p3) target bundleno = 416 (0x1a0), region = 40  ;;  %s561_s16 = sshll.u32 (!%p220_p3), %s225_s12, 7 }
  0x2c   : > { %s226_s17 = scalar_lea.sflag (!%p220_p3), [#allocation4], %s225_s12  ;;  %s229_s18 = scalar_lea.vmem (!%p220_p3), [#allocation3], %s561_s16 }
  0x32   : > { %700 = dma.done.wait (%p803_p7), %s226_s17, 2048  }
  0x33   : > { %702 = vsyncadd (%p803_p7), %s226_s17, 4294965248  ;;  %v282_v0 = vld [vmem:[%s229_s18] sm:$0xff]  ;;  %v298_v1 = vld [vmem:[%s229_s18 + $0x8] sm:$0xff]  ;;  %vm389_vm0 = vcmask 31744   ;;  %p257_p7 = scmp.lt.s32.totalorder %s717_s21, 1  ;;  %vm470_vm1 = vcmask 7168  }
  0x34   : > { %v284_v2 = vld [vmem:[%s229_s18 + $0x20] sm:$0xff]  ;;  %v314_v3 = vadd.f32 %v298_v1, %v282_v0  ;;  %v300_v4 = vld [vmem:[%s229_s18 + $0x28] sm:$0xff]  ;;  %v283_v5 = vld [vmem:[%s229_s18 + $0x10] sm:$0xff] }
  0x35   : > { %v299_v6 = vld [vmem:[%s229_s18 + $0x18] sm:$0xff]  ;;  %v316_v7 = vadd.f32 %v300_v4, %v284_v2  ;;  %v285_v8 = vld [vmem:[%s229_s18 + $0x30] sm:$0xff]  ;;  %v286_v12 = vld [vmem:[%s229_s18 + $0x40] sm:$0xff]  ;;  %s964_s21 = smov (!%p257_p7, %s717_s21), 1 }
  0x36   : > { %v301_v9 = vld [vmem:[%s229_s18 + $0x38] sm:$0xff]  ;;  %349 = vadd.xlane.f32.xlu0 %v314_v3  ;;  %v315_v10 = vadd.f32 %v299_v6, %v283_v5  ;;  %v302_v13 = vld [vmem:[%s229_s18 + $0x48] sm:$0xff]  ;;  %v287_v14 = vld [vmem:[%s229_s18 + $0x50] sm:$0xff]  ;;  %s571_s17 = sshll.u32 %s964_s21, 5 }
  0x37   : > { %353 = vadd.xlane.f32.xlu1 %v316_v7  ;;  %v317_v11 = vadd.f32 %v301_v9, %v285_v8  ;;  %v303_v15 = vld [vmem:[%s229_s18 + $0x58] sm:$0xff]  ;;  %v318_v16 = vadd.f32 %v302_v13, %v286_v12  ;;  %v288_v18 = vld [vmem:[%s229_s18 + $0x60] sm:$0xff]  ;;  %v304_v19 = vld [vmem:[%s229_s18 + $0x68] sm:$0xff]  ;;  %s261_s11 = scalar_lea.vmem %s952_s5, %s571_s17 }
  0x38   : > { %v319_v17 = vadd.f32 %v303_v15, %v287_v14  ;;  %v289_v20 = vld [vmem:[%s229_s18 + $0x70] sm:$0xff]  ;;  %v305_v21 = vld [vmem:[%s229_s18 + $0x78] sm:$0xff]  ;;  %v320_v22 = vadd.f32 %v304_v19, %v288_v18  ;;  %v373_v27 = vld [vmem:[%s948_s1] sm:$0xff] }
  0x39   : > { %v321_v23 = vadd.f32 %v305_v21, %v289_v20  ;;  %v375_v29 = vld [vmem:[%s948_s1 + $0x10] sm:$0xff]  ;;  %v374_v30 = vld [vmem:[%s948_s1 + $0x8] sm:$0xff]  ;;  %v376_v34 = vld [vmem:[%s948_s1 + $0x18] sm:$0xff] }
  0x3a   : > { %351 = vadd.xlane.f32.xlu0 %v315_v10  ;;  %v377_v40 = vld [vmem:[%s948_s1 + $0x20] sm:$0xff]  ;;  %v378_v45 = vld [vmem:[%s948_s1 + $0x28] sm:$0xff]  ;;  %v379_v54 = vld [vmem:[%s948_s1 + $0x30] sm:$0xff]  ;;  %v418_v10 = vlaneseq }
  0x3b   : > { %355 = vadd.xlane.f32.xlu1 %v317_v11  ;;  %v380_v58 = vld [vmem:[%s948_s1 + $0x38] sm:$0xff]  ;;  %v411_v14 = vld [vmem:[%s949_s2] sm:$0x1]  ;;  %v415_v19 = vld [vmem:[%s950_s3 + $0x8] sm:$0xff] }
  0x3c   : > { %v419_v13 = vshrl.u32 %v418_v10, 7  ;;  %v414_v20 = vld [vmem:[%s950_s3] sm:$0xff] }
  0x3e   : > { %357 = vadd.xlane.f32.xlu0 %v318_v16 }
  0x3f   : > { %359 = vadd.xlane.f32.xlu1 %v319_v17  ;;  %v420_v17 = vsub.s32 0, %v419_v13 }
  0x42   : > { %361 = vadd.xlane.f32.xlu0 %v320_v22  ;;  %v417_v22 = vld [vmem:[%s950_s3 + $0x18] sm:$0xff] }
  0x43   : > { %363 = vadd.xlane.f32.xlu1 %v321_v23  ;;  %v416_v23 = vld [vmem:[%s950_s3 + $0x10] sm:$0xff] }
  0xc3   : > { %v350_v24 = vpop.xlane.xlu0 %349 }
  0xc4   : > { %v365_v25 = vmul.f32 0.00390625, %v350_v24  ;;  %v354_v26 = vpop.xlane.xlu1 %353 }
  0xc5   : > { %v367_v28 = vmul.f32 0.00390625, %v354_v26 }
  0xc6   : > { %v381_v32 = vmul.f32 %v373_v27, %v365_v25 }
  0xc7   : > { %v352_v31 = vpop.xlane.xlu0 %351  ;;  %v383_v37 = vmul.f32 %v375_v29, %v367_v28 }
  0xc8   : > { %v366_v33 = vmul.f32 0.00390625, %v352_v31  ;;  %v356_v35 = vpop.xlane.xlu1 %355  ;;  %v390_v42 = vsel %vm389_vm0, %v381_v32, 0.0  ;;  %v439_v32 = vld [vmem:[%s951_s4 + $0x8] sm:$0xff] }
  0xc9   : > { %v368_v36 = vmul.f32 0.00390625, %v356_v35  ;;  %v393_v49 = vsel %vm389_vm0, %v383_v37, 0.0 }
  0xca   : > { %v382_v38 = vmul.f32 %v374_v30, %v366_v33  ;;  %v438_v33 = vld [vmem:[%s951_s4] sm:$0xff] }
  0xcb   : > { %v384_v39 = vmul.f32 %v376_v34, %v368_v36  ;;  %v358_v41 = vpop.xlane.xlu0 %357 }
  0xcc   : > { %v391_v43 = vsel %vm389_vm0, %v382_v38, 0.0  ;;  %v369_v44 = vmul.f32 0.00390625, %v358_v41  ;;  %v360_v46 = vpop.xlane.xlu1 %359  ;;  %v441_v38 = vld [vmem:[%s951_s4 + $0x18] sm:$0xff] }
  0xcd   : > { %v392_v47 = vadd.f32 %v391_v43, %v390_v42  ;;  %v370_v48 = vmul.f32 0.00390625, %v360_v46  ;;  %v395_v50 = vsel %vm389_vm0, %v384_v39, 0.0  ;;  %v440_v39 = vld [vmem:[%s951_s4 + $0x10] sm:$0xff] }
  0xce   : > { %v385_v51 = vmul.f32 %v377_v40, %v369_v44 }
  0xcf   : > { %v394_v52 = vadd.f32 %v393_v49, %v392_v47  ;;  %v386_v53 = vmul.f32 %v378_v45, %v370_v48  ;;  %v362_v55 = vpop.xlane.xlu0 %361 }
  0xd0   : > { %v397_v56 = vsel %vm389_vm0, %v385_v51, 0.0  ;;  %v371_v57 = vmul.f32 0.00390625, %v362_v55  ;;  %v364_v59 = vpop.xlane.xlu1 %363 }
  0xd1   : > { %v396_v60 = vadd.f32 %v395_v50, %v394_v52  ;;  %v372_v61 = vmul.f32 0.00390625, %v364_v59  ;;  %v399_v62 = vsel %vm389_vm0, %v386_v53, 0.0 }
  0xd2   : > { %v387_v63 = vmul.f32 %v379_v54, %v371_v57 }
  0xd3   : > { %v398_v0 = vadd.f32 %v397_v56, %v396_v60  ;;  %v388_v1 = vmul.f32 %v380_v58, %v372_v61 }
  0xd4   : > { %v401_v2 = vsel %vm389_vm0, %v387_v63, 0.0 }
  0xd5   : > { %v400_v3 = vadd.f32 %v399_v62, %v398_v0  ;;  %v403_v4 = vsel %vm389_vm0, %v388_v1, 0.0 }
  0xd7   : > { %v402_v5 = vadd.f32 %v401_v2, %v400_v3 }
  0xd9   : > { %v404_v6 = vadd.f32 %v403_v4, %v402_v5 }
  0xdb   : > { %v405_v7 = vrot.slane %v404_v6, 4 }
  0xdd   : > { %v406_v8 = vadd.f32 %v405_v7, %v404_v6 }
  0xdf   : > { %v407_v9 = vrot.slane %v406_v8, 2 }
  0xe1   : > { %v408_v11 = vadd.f32 %v407_v9, %v406_v8 }
  0xe3   : > { %v409_v12 = vrot.slane %v408_v11, 1 }
  0xe5   : > { %v410_v15 = vadd.f32 %v409_v12, %v408_v11 }
  0xe7   : > { %v412_v16 = vadd.f32 %v411_v14, %v410_v15 }
  0xe9   : > { %v413_v18 = vmax.f32 %v412_v16, 0.0 }
  0xeb   : > { %v421_v21 = vrot.slane %v413_v18, %v420_v17 }
  0xed   : > { %v423_v24 = vmul.f32 %v421_v21, %v415_v19  ;;  %v422_v25 = vmul.f32 %v421_v21, %v414_v20  ;;  %v425_v28 = vmul.f32 %v421_v21, %v417_v22  ;;  %v424_v29 = vmul.f32 %v421_v21, %v416_v23 }
  0xef   : > { %v429_v26 = vsel %vm389_vm0, %v423_v24, 0.0  ;;  %v426_v27 = vsel %vm389_vm0, %v422_v25, 0.0  ;;  %v435_v30 = vsel %vm389_vm0, %v425_v28, 0.0  ;;  %v432_v31 = vsel %vm389_vm0, %v424_v29, 0.0 }
  0xf0   : > { %430 = vadd.xlane.f32.xlu1 %v429_v26  ;;  %427 = vadd.xlane.f32.xlu0 %v426_v27 }
  0xf4   : > { %436 = vadd.xlane.f32.xlu1 %v435_v30  ;;  %433 = vadd.xlane.f32.xlu0 %v432_v31 }
 0x17d   : > { %v431_v34 = vpop.xlane.xlu1 %430  ;;  %v428_v35 = vpop.xlane.xlu0 %427 }
 0x17e   : > { %v443_v36 = vadd.f32 %v439_v32, %v431_v34  ;;  %v442_v37 = vadd.f32 %v438_v33, %v428_v35 }
 0x180   : > { %v565_v40 = vmul.f32 -1.442695, %v443_v36  ;;  %v564_v41 = vmul.f32 -1.442695, %v442_v37 }
 0x181   : > { %v437_v42 = vpop.xlane.xlu1 %436  ;;  %v434_v43 = vpop.xlane.xlu0 %433 }
 0x182   : > { %629 = vpow2.f32 %v565_v40  ;;  %v445_v44 = vadd.f32 %v441_v38, %v437_v42  ;;  %v444_v45 = vadd.f32 %v440_v39, %v434_v43 }
 0x183   : > { %631 = vpow2.f32 %v564_v41 }
 0x184   : > { %v567_v46 = vmul.f32 -1.442695, %v445_v44  ;;  %v566_v47 = vmul.f32 -1.442695, %v444_v45 }
 0x186   : > { %633 = vpow2.f32 %v567_v46 }
 0x187   : > { %635 = vpow2.f32 %v566_v47 }
 0x18c   : > { %v630_v48 = vpop.eup %629 }
 0x18d   : > { %v632_v49 = vpop.eup %631  ;;  %v459_v50 = vadd.f32 1.0, %v630_v48 }
 0x18e   : > { %v458_v51 = vadd.f32 1.0, %v632_v49 }
 0x18f   : > { %637 = vrcp.f32 %v459_v50 }
 0x190   : > { %v634_v52 = vpop.eup %633  ;;  %639 = vrcp.f32 %v458_v51 }
 0x191   : > { %v636_v53 = vpop.eup %635  ;;  %v461_v54 = vadd.f32 1.0, %v634_v52 }
 0x192   : > { %v460_v55 = vadd.f32 1.0, %v636_v53 }
 0x193   : > { %641 = vrcp.f32 %v461_v54 }
 0x194   : > { %643 = vrcp.f32 %v460_v55 }
 0x199   : > { %v638_v56 = vpop.eup %637 }
 0x19a   : > { %v640_v57 = vpop.eup %639  ;;  %472 = vst.msk [vmem:[%s261_s11 + $0x8] sm:$0xff] %vm470_vm1, %v638_v56 }
 0x19b   : > { %471 = vst.msk [vmem:[%s261_s11] sm:$0xff] %vm470_vm1, %v640_v57 }
 0x19d   : > { %v642_v58 = vpop.eup %641 }
 0x19e   : > { %v644_v59 = vpop.eup %643  ;;  %474 = vst.msk [vmem:[%s261_s11 + $0x18] sm:$0xff] %vm470_vm1, %v642_v58 }
 0x19f   : > { %473 = vst.msk [vmem:[%s261_s11 + $0x10] sm:$0xff] %vm470_vm1, %v644_v59 }
 0x1a0 PF: > { %s18_s23 = sadd.s32 1, %s725_s23   ;;  %s956_s18 = smov %s709_s19 }
 0x1a1   : > { %p15_p9 = scmp.ge.s32.totalorder %s18_s23, 4   ;;  %s957_s19 = smov %s713_s20 }
 0x1a2   : > { %s958_s20 = smov %s809_s30  ;;  %s959_s21 = smov %s721_s22 }
 0x1a3   : > { %s960_s22 = smov %s962_s25  ;;  %17 = sbr.rel (!%p15_p9) target bundleno = 4 (0x4), region = 88 }
 0x1aa   :  { %496 = vsyncpa [#allocation4], 1 }
 0x1ab   :  { %498 = vsyncpa [#allocation4 + $0x1], 1 }

</bundles_post_ra>
